<compile_context>
chip_gen: v5e
topology: v5e:2x2
jax: 0.10.0
libtpu: 0.0.40
codegen_flags: <defaults>
</compile_context>

<pallas_src>
import math
import functools

import jax
import jax.numpy as jnp
from jax import lax
from jax.experimental import pallas as pl
from jax.experimental.pallas import tpu as pltpu


# ----------------------------------------------------------------------------
# Kernel
# ----------------------------------------------------------------------------
def _attn_kernel(qkv_ref, o_ref, *, ch, Tp, tq, kv_len, scale, exp_dtype):
    # qkv_ref block: (bh, 3*ch, Tp);  o_ref block: (bh, ch, tq)
    if tq == Tp:
        q = qkv_ref[:, 0:ch, :]                               # (bh, ch, tq)
    else:
        j = pl.program_id(1)
        start = pl.multiple_of(j * tq, tq)
        q = qkv_ref[:, 0:ch, pl.ds(start, tq)]                # (bh, ch, tq)
    k = qkv_ref[:, ch:2 * ch, :]                              # (bh, ch, Tp)
    v = qkv_ref[:, 2 * ch:3 * ch, :]                          # (bh, ch, Tp)

    # Full 1/sqrt(ch) scale on q only (== ch**-0.25 applied to both q and k).
    q = q * jnp.asarray(scale, q.dtype)

    # w[b, t, s] = sum_c q[b, c, t] * k[b, c, s]   ('bct,bcs->bts')
    # Native-dtype MXU operands, f32 accumulation.
    w = lax.dot_general(
        q, k,
        dimension_numbers=(((1,), (1,)), ((0,), (0,))),
        preferred_element_type=jnp.float32)                   # (bh, tq, Tp) f32

    # Mask padded key positions (only present when T was padded to 128 lanes).
    if kv_len < Tp:
        key_pos = lax.broadcasted_iota(jnp.int32, w.shape, 2)
        w = jnp.where(key_pos < kv_len, w, -jnp.inf)

    # Softmax numerator only — normalization is deferred past the PV matmul so
    # the full (tq, Tp) tile is never touched again after exp.
    w_max = jnp.max(w, axis=-1, keepdims=True)
    w_exp = jnp.exp((w - w_max).astype(exp_dtype))            # EUP; bf16 fast path
    denom = jnp.sum(w_exp, axis=-1, dtype=jnp.float32)        # (bh, tq) f32

    p = w_exp.astype(v.dtype)                                 # unnormalized, in [0, 1]

    # a[b, c, t] = sum_s p[b, t, s] * v[b, c, s]   ('bts,bcs->bct')
    # TODO(synk): if MLIR ever shows a per-step XLU transpose of p here, move it
    # to a once-per-head-group transpose of v into a (bh, Tp, ch) scratch.
    a = lax.dot_general(
        v, p,
        dimension_numbers=(((2,), (2,)), ((0,), (0,))),
        preferred_element_type=jnp.float32)                   # (bh, ch, tq) f32

    # Deferred, exact normalization: touches only bh*tq scalars.
    inv = (1.0 / denom)[:, None, :]                           # (bh, 1, tq)
    o_ref[...] = (a * inv).astype(o_ref.dtype)


# ----------------------------------------------------------------------------
# Tiling / generation-aware planning
# ----------------------------------------------------------------------------
def _round_up(x, m):
    return ((x + m - 1) // m) * m


def _vmem_plan():
    """Return (vmem_limit_bytes, working-set budget, small_vmem_chip)."""
    try:
        info = pltpu.get_tpu_info()
        vmem_cap = int(getattr(info, "vmem_capacity_bytes", 0)) or 128 * 1024 * 1024
    except Exception:
        vmem_cap = 128 * 1024 * 1024
    # 64 MiB/TC => v7x-like chip: keep scoped VMEM <= 32 MiB and feed 2 TCs.
    # TODO(synk): use an explicit core-count query instead of the VMEM heuristic.
    small_vmem = vmem_cap <= 64 * 1024 * 1024
    vmem_limit = 32 * 1024 * 1024 if small_vmem else 64 * 1024 * 1024
    budget = (vmem_limit * 3) // 5            # headroom for compiler scratch
    return vmem_limit, budget, small_vmem


def _plan_tiles(B, ch, T, itemsize, budget, small_vmem):
    """Pick (heads-per-step bh, query tile tq, padded length Tp, deep_buffer)."""
    tq_cap = 256 if small_vmem else 512

    # --- padded length -------------------------------------------------------
    if T % 128 == 0:
        Tp = T
    elif 2 * T * T * 4 <= budget // 2:
        Tp = T                               # full-length score tile fits
    else:
        Tp = _round_up(T, 128)               # pad so tq can be lane-tiled

    def footprint(bh, tq):
        qkv_blk = bh * 3 * ch * Tp * itemsize
        out_blk = bh * ch * tq * itemsize
        scores = 2 * bh * tq * Tp * 4        # w + w_exp in f32
        return 2 * (qkv_blk + out_blk) + scores   # 2x: double-buffered blocks

    # --- query tile (multiple of 128 dividing Tp, or the full length) --------
    if Tp % 128 == 0:
        if Tp <= tq_cap and footprint(1, Tp) <= budget:
            tq = Tp
        else:
            tq = 128
            for cand in (512, 384, 256, 128):
                if cand <= tq_cap and cand <= Tp and Tp % cand == 0 \
                        and footprint(1, cand) <= budget:
                    tq = cand
                    break
    else:
        tq = Tp

    # --- heads per grid step (budget-driven, largest divisor of B, cap 64) ---
    divisors = [d for d in range(1, min(B, 64) + 1) if B % d == 0]
    bh = 1
    for d in divisors:
        if footprint(d, tq) <= budget:
            bh = d

    # --- v7x: keep >= 2 parallel grid steps so both TensorCores get work -----
    n_qt = Tp // tq
    if small_vmem and (B // bh) * n_qt < 2:
        for d in reversed(divisors):
            if d <= bh and (B // d) * n_qt >= 2:
                bh = d
                break

    # --- deeper input buffering for the small-T / single-query-tile case -----
    deep_buffer = (n_qt == 1 and (B // bh) >= 3
                   and footprint(bh, tq) + bh * 3 * ch * Tp * itemsize <= budget)

    return bh, tq, Tp, deep_buffer


def _make_qkv_spec(block_shape, index_map, deep_buffer):
    if deep_buffer:
        try:
            return pl.BlockSpec(block_shape, index_map, pipeline_mode=pl.Buffered(3))
        except TypeError:
            pass
    return pl.BlockSpec(block_shape, index_map)


# ----------------------------------------------------------------------------
# Wrapper
# ----------------------------------------------------------------------------
def qkv_attention_legacy(qkv, n_heads, *, exp_in_low_precision=None):
    """Pallas implementation of QKVAttentionLegacy.forward.

    qkv: (bs, 3*n_heads*ch, length)  ->  (bs, n_heads*ch, length)
    """
    bs, width, length = qkv.shape
    assert width % (3 * n_heads) == 0
    ch = width // (3 * n_heads)
    B = bs * n_heads
    T = length
    scale = 1.0 / math.sqrt(ch)

    # Free reshape only — q/k/v are sliced inside the kernel (single fused DMA).
    qkv_r = qkv.reshape(B, 3 * ch, T)
    itemsize = jnp.dtype(qkv.dtype).itemsize

    vmem_limit, budget, small_vmem = _vmem_plan()
    bh, tq, Tp, deep_buffer = _plan_tiles(B, ch, T, itemsize, budget, small_vmem)
    n_qt = Tp // tq

    if Tp != T:
        qkv_r = jnp.pad(qkv_r, ((0, 0), (0, 0), (0, Tp - T)))

    if exp_in_low_precision is None:
        # bf16 exp roughly halves EUP cost on v6e/v7x; result is cast back to
        # the (bf16) input dtype anyway, so accuracy stays within output dtype.
        exp_in_low_precision = qkv.dtype == jnp.bfloat16
    exp_dtype = jnp.bfloat16 if exp_in_low_precision else jnp.float32

    kernel = functools.partial(_attn_kernel, ch=ch, Tp=Tp, tq=tq, kv_len=T,
                               scale=scale, exp_dtype=exp_dtype)

    cost = pl.CostEstimate(
        flops=4 * B * ch * T * T,          # two matmuls, 2*ch*T*T each
        transcendentals=B * T * T,         # exp in softmax
        bytes_accessed=(3 * B * ch * T + B * ch * T) * itemsize,
    )

    qkv_spec = _make_qkv_spec((bh, 3 * ch, Tp), lambda b, j: (b, 0, 0), deep_buffer)

    out = pl.pallas_call(
        kernel,
        out_shape=jax.ShapeDtypeStruct((B, ch, Tp), qkv.dtype),
        grid_spec=pltpu.PrefetchScalarGridSpec(
            num_scalar_prefetch=0,
            grid=(B // bh, n_qt),
            # One fused block per head-group; k/v stay resident across the
            # query-tile axis (index_map ignores j -> no re-DMA).
            in_specs=[qkv_spec],
            out_specs=pl.BlockSpec((bh, ch, tq), lambda b, j: (b, 0, j)),
        ),
        compiler_params=pltpu.CompilerParams(
            dimension_semantics=("parallel", "parallel"),
            vmem_limit_bytes=vmem_limit,
        ),
        cost_estimate=cost,
    )(qkv_r)

    if Tp != T:
        out = out[:, :, :T]
    return out.reshape(bs, n_heads * ch, T)


# ----------------------------------------------------------------------------
# Reference + self-test
# ----------------------------------------------------------------------------
def _reference(qkv, n_heads):
    bs, width, length = qkv.shape
    ch = width // (3 * n_heads)
    B = bs * n_heads
    qkv_r = qkv.reshape(B, 3 * ch, length)
    q, k, v = qkv_r[:, :ch], qkv_r[:, ch:2 * ch], qkv_r[:, 2 * ch:]
    s = 1.0 / math.sqrt(math.sqrt(ch))
    w = jnp.einsum('bct,bcs->bts', q * s, k * s)
    w = jax.nn.softmax(w.astype(jnp.float32), axis=-1).astype(w.dtype)
    a = jnp.einsum('bts,bcs->bct', w, v)
    return a.reshape(bs, -1, length)


if __name__ == "__main__":
    # Small, deterministic shapes: bs=2, n_heads=2, ch=16, length=32
    bs, n_heads, ch, length = 2, 2, 16, 32
    width = 3 * n_heads * ch  # 96

    key = jax.random.PRNGKey(0)
    qkv = jax.random.normal(key, (bs, width, length), dtype=jnp.float32)

    out = qkv_attention_legacy(qkv, n_heads)
    out = jax.block_until_ready(out)

    ref = _reference(qkv, n_heads)
    assert out.shape == (bs, n_heads * ch, length), out.shape
    assert jnp.allclose(out, ref, atol=1e-4, rtol=1e-4), "mismatch vs reference"

    print("KERNEL_OK")
</pallas_src>

<mosaic_0001>
module attributes {stable_mosaic.version = 11 : i64} {
  func.func @_attn_kernel(%arg0: i32, %arg1: i32, %arg2: memref<4x48x32xf32, #tpu.memory_space<vmem>>, %arg3: memref<4x16x32xf32, #tpu.memory_space<vmem>>) attributes {dimension_semantics = [#tpu.dimension_semantics<parallel>, #tpu.dimension_semantics<parallel>], iteration_bounds = array<i64: 1, 1>, scalar_prefetch = 0 : i64, scratch_operands = 0 : i64, tpu.core_type = #tpu.core_type<tc>, window_params = [{transform_indices = @transform_0, window_bounds = array<i64: 4, 48, 32>}, {transform_indices = @transform_1, window_bounds = array<i64: 4, 16, 32>}]} {
    %c0 = arith.constant 0 : index
    %c0_0 = arith.constant 0 : index
    %c0_1 = arith.constant 0 : index
    %0 = vector.load %arg2[%c0, %c0_0, %c0_1] : memref<4x48x32xf32, #tpu.memory_space<vmem>>, vector<4x16x32xf32>
    %c0_2 = arith.constant 0 : index
    %c16 = arith.constant 16 : index
    %c0_3 = arith.constant 0 : index
    %1 = vector.load %arg2[%c0_2, %c16, %c0_3] : memref<4x48x32xf32, #tpu.memory_space<vmem>>, vector<4x16x32xf32>
    %c0_4 = arith.constant 0 : index
    %c32 = arith.constant 32 : index
    %c0_5 = arith.constant 0 : index
    %2 = vector.load %arg2[%c0_4, %c32, %c0_5] : memref<4x48x32xf32, #tpu.memory_space<vmem>>, vector<4x16x32xf32>
    %cst = arith.constant 2.500000e-01 : f32
    %3 = vector.broadcast %cst : f32 to vector<4x16x32xf32>
    %4 = arith.mulf %0, %3 : vector<4x16x32xf32>
    %cst_6 = arith.constant dense<0.000000e+00> : vector<4x32x32xf32>
    %5 = tpu.matmul %4, %1, %cst_6 {dimension_numbers = #tpu.dot_dimension_numbers<[1], [1], [2], [2], [0, 0, 0, 2, 1, 2], [0], [0]>} : vector<4x16x32xf32>, vector<4x16x32xf32>, vector<4x32x32xf32> -> vector<4x32x32xf32>
    %cst_7 = arith.constant dense<0xFF800000> : vector<4x32xf32>
    %6 = vector.multi_reduction <maximumf>, %5, %cst_7 [2] : vector<4x32x32xf32> to vector<4x32xf32>
    %7 = vector.shape_cast %6 : vector<4x32xf32> to vector<4x32x1xf32>
    %8 = vector.broadcast %7 : vector<4x32x1xf32> to vector<4x32x32xf32>
    %9 = arith.subf %5, %8 : vector<4x32x32xf32>
    %10 = math.exp %9 : vector<4x32x32xf32>
    %cst_8 = arith.constant dense<0.000000e+00> : vector<4x32xf32>
    %11 = vector.multi_reduction <add>, %10, %cst_8 [2] : vector<4x32x32xf32> to vector<4x32xf32>
    %cst_9 = arith.constant dense<0.000000e+00> : vector<4x16x32xf32>
    %12 = tpu.matmul %2, %10, %cst_9 {dimension_numbers = #tpu.dot_dimension_numbers<[2], [2], [1], [1], [0, 0, 0, 1, 1, 1], [0], [0]>} : vector<4x16x32xf32>, vector<4x32x32xf32>, vector<4x16x32xf32> -> vector<4x16x32xf32>
    %cst_10 = arith.constant 1.000000e+00 : f32
    %13 = vector.broadcast %cst_10 : f32 to vector<4x32xf32>
    %14 = arith.divf %13, %11 : vector<4x32xf32>
    %15 = vector.shape_cast %14 : vector<4x32xf32> to vector<4x1x32xf32>
    %16 = vector.broadcast %15 : vector<4x1x32xf32> to vector<4x16x32xf32>
    %17 = arith.mulf %12, %16 : vector<4x16x32xf32>
    %c0_11 = arith.constant 0 : index
    %c0_12 = arith.constant 0 : index
    %c0_13 = arith.constant 0 : index
    %18 = vector.load %arg3[%c0_11, %c0_12, %c0_13] : memref<4x16x32xf32, #tpu.memory_space<vmem>>, vector<4x16x32xf32>
    tpu.vector_store %arg3[%c0_11, %c0_12, %c0_13], %17 {strides = array<i32>} : memref<4x16x32xf32, #tpu.memory_space<vmem>>, vector<4x16x32xf32>,
    return
  }
  func.func @transform_0(%arg0: i32, %arg1: i32) -> (i32, i32, i32) {
    %c0_i32 = arith.constant 0 : i32
    %c0_i32_0 = arith.constant 0 : i32
    %c0_i32_1 = arith.constant 0 : i32
    return %arg0, %c0_i32, %c0_i32_0 : i32, i32, i32
  }
  func.func @transform_1(%arg0: i32, %arg1: i32) -> (i32, i32, i32) {
    %c0_i32 = arith.constant 0 : i32
    %c0_i32_0 = arith.constant 0 : i32
    return %arg0, %c0_i32, %arg1 : i32, i32, i32
  }
}

</mosaic_0001>

<bundles_post_ra>
// kernel: tpu_custom_call.1
= control target key start
LH: loop header
LB: loop body
LE: loop exit
PB: predicated region body
PF: predicated region fallthrough
CT: control target
= control target key end

     0   :  { %s1757_s0 = inlined_call_operand.vmem [shape: f32[4,48,32], index: 0, kind: input, shape index: {}]   ;;  %s1758_s1 = inlined_call_operand.hbm [shape: f32[4,16,32], index: 1, kind: output, shape index: {}]  }
   0x1   :  { %v15_v0 = vld [vmem:[%s1757_s0 + $0x90] sm:$0xff]  ;;  %v13_v1 = vld [vmem:[%s1757_s0 + $0x60] sm:$0xff] }
   0x2   :  { %v39_v2 = vmul.f32 0.25, %v15_v0  ;;  %v37_v3 = vmul.f32 0.25, %v13_v1  ;;  %v9_v4 = vld [vmem:[%s1757_s0] sm:$0xff] }
   0x3   :  { %v33_v5 = vmul.f32 0.25, %v9_v4 }
   0x4   :  { %6 = vsyncpa [#allocation3], 0  ;;  %261 = vxpose.xlu1.b32.start [1/2] (short) (narrow) %v39_v2, 32  ;;  %188 = vxpose.xlu0.b32.start [1/2] (short) (narrow) %v37_v3, 32  ;;  %v16_v6 = vld [vmem:[%s1757_s0 + $0x98] sm:$0xff]  ;;  %v14_v7 = vld [vmem:[%s1757_s0 + $0x68] sm:$0xff] }
   0x5   :  { %41 = vxpose.xlu2.b32.start [1/2] (short) (narrow) %v33_v5, 32  ;;  %v10_v8 = vld [vmem:[%s1757_s0 + $0x8] sm:$0xff]  ;;  %v40_v9 = vmul.f32 0.25, %v16_v6  ;;  %v38_v10 = vmul.f32 0.25, %v14_v7  ;;  %v22_v12 = vld [vmem:[%s1757_s0 + $0x78] sm:$0xff]  ;;  %v21_v14 = vld [vmem:[%s1757_s0 + $0x70] sm:$0xff] }
   0x6   :  { %v34_v11 = vmul.f32 0.25, %v10_v8  ;;  %v24_v13 = vld [vmem:[%s1757_s0 + $0xa8] sm:$0xff]  ;;  %246 = vmatpush.msra.mxu2 %v22_v12  ;;  %v23_v15 = vld [vmem:[%s1757_s0 + $0xa0] sm:$0xff]  ;;  %v11_v16 = vld [vmem:[%s1757_s0 + $0x30] sm:$0xff]  ;;  %vm73_vm0 = vcmask 130048   ;;  %vm334_vm1 = vcmask 261120  }
   0x7   :  { %319 = vmatpush.msra.mxu3 %v24_v13  ;;  %v35_v17 = vmul.f32 0.25, %v11_v16  ;;  %v12_v18 = vld [vmem:[%s1757_s0 + $0x38] sm:$0xff]  ;;  %v17_v21 = vld [vmem:[%s1757_s0 + $0x10] sm:$0xff]  ;;  %v20_v23 = vld [vmem:[%s1757_s0 + $0x48] sm:$0xff]  ;;  %s991_s28 = sshll.u32 %s1758_s1, 4  ;;  %s1138_s29 = smov 128   ;;  %s992_s28 = int_to_ptr.hbm [resolvable:$true] %s991_s28 }
   0x8   :  { %247 = vmatpush.msra.mxu2 %v21_v14  ;;  %v36_v19 = vmul.f32 0.25, %v12_v18  ;;  %v18_v20 = vld [vmem:[%s1757_s0 + $0x18] sm:$0xff]  ;;  %v19_v24 = vld [vmem:[%s1757_s0 + $0x40] sm:$0xff]  ;;  %173 = vmatpush.msra.mxu1 %v20_v23  ;;  %s1139_s30 = smov 8  }
   0x9   :  { %320 = vmatpush.msra.mxu3 %v23_v15  ;;  %100 = vmatpush.msra.mxu0 %v18_v20 }
   0xa   :  { %174 = vmatpush.msra.mxu1 %v19_v24 }
   0xb   :  { %101 = vmatpush.msra.mxu0 %v17_v21 }
   0xc   :  { %262 = vxpose.xlu1.b32.end [2/2] (short) (narrow) %v40_v9, 32  ;;  %189 = vxpose.xlu0.b32.end [2/2] (short) (narrow) %v38_v10, 32 }
   0xd   :  { %42 = vxpose.xlu2.b32.end [2/2] (short) (narrow) %v34_v11, 32 }
  0x24   :  { %115 = vxpose.xlu0.b32.start [1/2] (short) (narrow) %v35_v17, 32 }
  0x2c   :  { %116 = vxpose.xlu0.b32.end [2/2] (short) (narrow) %v36_v19, 32 }
  0x9e   :  { %v57_v22 = vpop.trf.xlu2 }
  0x9f   :  { %1003 = vmatmul.msk.f32.vlgmr.msra.gmra.mxu0 %vm73_vm0, %v57_v22 }
  0xa6   :  { %v58_v25 = vpop.trf.xlu2 }
  0xa7   :  { %1004 = vmatmul.msk.f32.gmra.mxu0 %vm73_vm0, %v58_v25 }
  0xa8   :  { %v277_v26 = vpop.trf.xlu1  ;;  %v204_v27 = vpop.trf.xlu0 }
  0xa9   :  { %1011 = vmatmul.msk.f32.vlgmr.msra.gmra.mxu2 %vm73_vm0, %v204_v27  ;;  %1015 = vmatmul.msk.f32.vlgmr.msra.gmra.mxu3 %vm73_vm0, %v277_v26 }
  0xae   :  { %v59_v28 = vpop.trf.xlu2 }
  0xaf   :  { %1005 = vmatmul.msk.f32.gmra.mxu0 %vm73_vm0, %v59_v28 }
  0xb0   :  { %v278_v29 = vpop.trf.xlu1  ;;  %v205_v30 = vpop.trf.xlu0 }
  0xb1   :  { %1012 = vmatmul.msk.f32.gmra.mxu2 %vm73_vm0, %v205_v30  ;;  %1016 = vmatmul.msk.f32.gmra.mxu3 %vm73_vm0, %v278_v29 }
  0xb6   :  { %v60_v33 = vpop.trf.xlu2 }
  0xb7   :  { %1006 = vmatmul.msk.f32.gmra.mxu0 %vm73_vm0, %v60_v33 }
  0xb8   :  { %v279_v31 = vpop.trf.xlu1  ;;  %v206_v32 = vpop.trf.xlu0 }
  0xb9   :  { %1013 = vmatmul.msk.f32.gmra.mxu2 %vm73_vm0, %v206_v32  ;;  %1017 = vmatmul.msk.f32.gmra.mxu3 %vm73_vm0, %v279_v31 }
  0xc0   :  { %v280_v34 = vpop.trf.xlu1  ;;  %v207_v35 = vpop.trf.xlu0 }
  0xc1   :  { %1014 = vmatmul.msk.f32.gmra.mxu2 %vm73_vm0, %v207_v35  ;;  %1018 = vmatmul.msk.f32.gmra.mxu3 %vm73_vm0, %v280_v34 }
  0xc8   :  { %v131_v36 = vpop.trf.xlu0 }
  0xc9   :  { %1007 = vmatmul.msk.f32.vlgmr.msra.gmra.mxu1 %vm73_vm0, %v131_v36 }
  0xd0   :  { %v132_v37 = vpop.trf.xlu0 }
  0xd1   :  { %1008 = vmatmul.msk.f32.gmra.mxu1 %vm73_vm0, %v132_v37 }
  0xd8   :  { %v133_v38 = vpop.trf.xlu0 }
  0xd9   :  { %1009 = vmatmul.msk.f32.gmra.mxu1 %vm73_vm0, %v133_v38 }
  0xe0   :  { %v134_v39 = vpop.trf.xlu0 }
  0xe1   :  { %1010 = vmatmul.msk.f32.gmra.mxu1 %vm73_vm0, %v134_v39 }
 0x11c   :  { %v103_v40 = vpop.f32.mrf.mxu0 }
 0x11d   :  { %v335_v53 = vsel %vm334_vm1, %v103_v40, -inf }
 0x124   :  { %v1218_v43 = vpop.f32.mrf.mxu0 }
 0x125   :  { %v338_v59 = vsel %vm334_vm1, %v1218_v43, -inf }
 0x12c   :  { %v1214_v41 = vpop.f32.mrf.mxu2  ;;  %v1216_v42 = vpop.f32.mrf.mxu3 }
 0x12d   :  { %v1228_v48 = vpop.f32.mrf.mxu0  ;;  %v359_v57 = vsel %vm334_vm1, %v1214_v41, -inf  ;;  %v371_v6 = vsel %vm334_vm1, %v1216_v42, -inf }
 0x12e   :  { %v341_v49 = vsel %vm334_vm1, %v1228_v48, -inf }
 0x134   :  { %v1220_v44 = vpop.f32.mrf.mxu2  ;;  %v1222_v45 = vpop.f32.mrf.mxu3 }
 0x135   :  { %v374_v46 = vsel %vm334_vm1, %v1222_v45, -inf  ;;  %v362_v47 = vsel %vm334_vm1, %v1220_v44, -inf  ;;  %v1256_v0 = vpop.f32.mrf.mxu0 }
 0x136   :  { %375 = vmax.xlane.f32.xlu1 %v374_v46  ;;  %363 = vmax.xlane.f32.xlu2 %v362_v47  ;;  %v344_v1 = vsel %vm334_vm1, %v1256_v0, -inf }
 0x13c   :  { %v1232_v50 = vpop.f32.mrf.mxu2  ;;  %v1234_v51 = vpop.f32.mrf.mxu3 }
 0x13d   :  { %v365_v52 = vsel %vm334_vm1, %v1232_v50, -inf  ;;  %v377_v63 = vsel %vm334_vm1, %v1234_v51, -inf }
 0x13e   :  { %366 = vmax.xlane.f32.xlu0 %v365_v52  ;;  %342 = vmax.xlane.f32.xlu2 %v341_v49 }
 0x144   :  { %v331_v54 = vpop.f32.mrf.mxu3  ;;  %v1264_v4 = vpop.f32.mrf.mxu2 }
 0x145   :  { %v380_v55 = vsel %vm334_vm1, %v331_v54, -inf  ;;  %v368_v5 = vsel %vm334_vm1, %v1264_v4, -inf }
 0x146   :  { %v1240_v56 = vpop.f32.mrf.mxu1  ;;  %336 = vmax.xlane.f32.xlu0 %v335_v53  ;;  %381 = vmax.xlane.f32.xlu2 %v380_v55 }
 0x147   :  { %v347_v62 = vsel %vm334_vm1, %v1240_v56, -inf }
 0x14e   :  { %v1244_v58 = vpop.f32.mrf.mxu1  ;;  %360 = vmax.xlane.f32.xlu2 %v359_v57 }
 0x14f   :  { %v350_v7 = vsel %vm334_vm1, %v1244_v58, -inf }
 0x156   :  { %v1248_v60 = vpop.f32.mrf.mxu1  ;;  %339 = vmax.xlane.f32.xlu2 %v338_v59 }
 0x157   :  { %v353_v61 = vsel %vm334_vm1, %v1248_v60, -inf }
 0x158   :  { %354 = vmax.xlane.f32.xlu1 %v353_v61 }
 0x15e   :  { %348 = vmax.xlane.f32.xlu2 %v347_v62  ;;  %v1260_v2 = vpop.f32.mrf.mxu1 }
 0x15f   :  { %v356_v3 = vsel %vm334_vm1, %v1260_v2, -inf }
 0x160   :  { %378 = vmax.xlane.f32.xlu1 %v377_v63 }
 0x168   :  { %345 = vmax.xlane.f32.xlu1 %v344_v1 }
 0x170   :  { %357 = vmax.xlane.f32.xlu1 %v356_v3 }
 0x178   :  { %369 = vmax.xlane.f32.xlu1 %v368_v5 }
 0x180   :  { %372 = vmax.xlane.f32.xlu1 %v371_v6 }
 0x188   :  { %351 = vmax.xlane.f32.xlu1 %v350_v7 }
 0x1a9   :  { %v364_v8 = vpop.xlane.xlu2 %363  ;;  %v376_v19 = vpop.xlane.xlu1 %375 }
 0x1aa   :  { %v396_v28 = vsub.f32 %v1222_v45, %v376_v19  ;;  %v392_v34 = vsub.f32 %v1220_v44, %v364_v8 }
 0x1ac   :  { %v425_v31 = vmul.f32 1.442695, %v396_v28  ;;  %v27_v28 = vld [vmem:[%s1757_s0 + $0x50] sm:$0xff] }
 0x1b1   :  { %v367_v9 = vpop.xlane.xlu0 %366  ;;  %v343_v10 = vpop.xlane.xlu2 %342 }
 0x1b2   :  { %v393_v37 = vsub.f32 %v1232_v50, %v367_v9  ;;  %v385_v49 = vsub.f32 %v1228_v48, %v343_v10 }
 0x1b4   :  { %v419_v45 = vmul.f32 1.442695, %v393_v37  ;;  %v403_v55 = vmul.f32 1.442695, %v385_v49 }
 0x1b9   :  { %v337_v11 = vpop.xlane.xlu0 %336  ;;  %v382_v12 = vpop.xlane.xlu2 %381 }
 0x1ba   :  { %v383_v13 = vsub.f32 %v103_v40, %v337_v11  ;;  %v398_v14 = vsub.f32 %v331_v54, %v382_v12 }
 0x1bc   :  { %v399_v15 = vmul.f32 1.442695, %v383_v13  ;;  %v429_v16 = vmul.f32 1.442695, %v398_v14 }
 0x1be   :  { %1047 = vpow2.f32 %v399_v15  ;;  %v25_v15 = vld [vmem:[%s1757_s0 + $0x20] sm:$0xff] }
 0x1bf   :  { %1049 = vpow2.f32 %v429_v16 }
 0x1c1   :  { %v361_v17 = vpop.xlane.xlu2 %360 }
 0x1c2   :  { %v391_v18 = vsub.f32 %v1214_v41, %v361_v17 }
 0x1c4   :  { %v1273_v20 = vpop.eup %1047  ;;  %v415_v21 = vmul.f32 1.442695, %v391_v18 }
 0x1c5   :  { %v1275_v22 = vpop.eup %1049  ;;  %v431_v23 = vsel %vm334_vm1, %v1273_v20, 0.0 }
 0x1c6   :  { %1051 = vpow2.f32 %v415_v21  ;;  %1037 = vmatpush.xpose.msk.msrb.mxu3 %vm334_vm1, %v1275_v22  ;;  %432 = vadd.xlane.f32.xlu1 %v431_v23  ;;  %v31_v21 = vld [vmem:[%s1757_s0 + $0xb0] sm:$0xff]  ;;  %v29_v23 = vld [vmem:[%s1757_s0 + $0x80] sm:$0xff] }
 0x1c9   :  { %v340_v24 = vpop.xlane.xlu2 %339 }
 0x1ca   :  { %v384_v25 = vsub.f32 %v1218_v43, %v340_v24  ;;  %v417_v43 = vmul.f32 1.442695, %v392_v34 }
 0x1cb   :  { %v355_v26 = vpop.xlane.xlu1 %354 }
 0x1cc   :  { %v1282_v27 = vpop.eup %1051  ;;  %v401_v29 = vmul.f32 1.442695, %v384_v25  ;;  %v389_v48 = vsub.f32 %v1248_v60, %v355_v26  ;;  %v32_v26 = vld [vmem:[%s1757_s0 + $0xb8] sm:$0xff] }
 0x1cd   :  { %v455_v30 = vsel %vm334_vm1, %v1282_v27, 0.0 }
 0x1ce   :  { %1053 = vpow2.f32 %v401_v29  ;;  %456 = vadd.xlane.f32.xlu0 %v455_v30  ;;  %v411_v3 = vmul.f32 1.442695, %v389_v48  ;;  %v28_v30 = vld [vmem:[%s1757_s0 + $0x58] sm:$0xff] }
 0x1cf   :  { %1055 = vpow2.f32 %v425_v31 }
 0x1d1   :  { %v349_v32 = vpop.xlane.xlu2 %348 }
 0x1d2   :  { %v387_v33 = vsub.f32 %v1240_v56, %v349_v32  ;;  %v476_v32 = vsel %vm334_vm1, %v1275_v22, 0.0 }
 0x1d3   :  { %v379_v35 = vpop.xlane.xlu1 %378 }
 0x1d4   :  { %v1054_v36 = vpop.eup %1053  ;;  %v407_v38 = vmul.f32 1.442695, %v387_v33  ;;  %v397_v39 = vsub.f32 %v1234_v51, %v379_v35 }
 0x1d5   :  { %v434_v40 = vsel %vm334_vm1, %v1054_v36, 0.0  ;;  %v1056_v46 = vpop.eup %1055 }
 0x1d6   :  { %1057 = vpow2.f32 %v407_v38  ;;  %v427_v41 = vmul.f32 1.442695, %v397_v39  ;;  %435 = vadd.xlane.f32.xlu0 %v434_v40  ;;  %v470_v51 = vsel %vm334_vm1, %v1056_v46, 0.0 }
 0x1d8   :  { %1059 = vpow2.f32 %v427_v41 }
 0x1d9   :  { %1061 = vpow2.f32 %v417_v43 }
 0x1da   :  { %1063 = vpow2.f32 %v419_v45 }
 0x1db   :  { %v346_v47 = vpop.xlane.xlu1 %345 }
 0x1dc   :  { %v1292_v44 = vpop.eup %1057  ;;  %v386_v50 = vsub.f32 %v1256_v0, %v346_v47 }
 0x1dd   :  { %v443_v52 = vsel %vm334_vm1, %v1292_v44, 0.0 }
 0x1de   :  { %v1060_v53 = vpop.eup %1059  ;;  %v405_v54 = vmul.f32 1.442695, %v386_v50  ;;  %471 = vadd.xlane.f32.xlu0 %v470_v51  ;;  %444 = vadd.xlane.f32.xlu2 %v443_v52 }
 0x1df   :  { %1038 = vmatpush.xpose.msk.msrb.mxu3 %vm334_vm1, %v1060_v53  ;;  %v1062_v56 = vpop.eup %1061  ;;  %v473_v12 = vsel %vm334_vm1, %v1060_v53, 0.0 }
 0x1e0   :  { %1065 = vpow2.f32 %v405_v54  ;;  %v1064_v57 = vpop.eup %1063  ;;  %v458_v63 = vsel %vm334_vm1, %v1062_v56, 0.0 }
 0x1e1   :  { %1067 = vpow2.f32 %v403_v55  ;;  %v461_v62 = vsel %vm334_vm1, %v1064_v57, 0.0  ;;  %v899_v55 = vlaneseq }
 0x1e3   :  { %v358_v59 = vpop.xlane.xlu1 %357  ;;  %1039 = vmatpush.xpose.msk.msrb.mxu3 %vm334_vm1, %v1056_v46 }
 0x1e4   :  { %v390_v61 = vsub.f32 %v1260_v2, %v358_v59 }
 0x1e6   :  { %v1305_v0 = vpop.eup %1065  ;;  %v413_v1 = vmul.f32 1.442695, %v390_v61  ;;  %462 = vadd.xlane.f32.xlu0 %v461_v62  ;;  %459 = vadd.xlane.f32.xlu2 %v458_v63 }
 0x1e7   :  { %1019 = vmatpush.xpose.msk.msrb.mxu0 %vm334_vm1, %v1305_v0  ;;  %v1068_v5 = vpop.eup %1067  ;;  %v440_v31 = vsel %vm334_vm1, %v1305_v0, 0.0 }
 0x1e8   :  { %1069 = vpow2.f32 %v413_v1  ;;  %v437_v2 = vsel %vm334_vm1, %v1068_v5, 0.0 }
 0x1e9   :  { %1071 = vpow2.f32 %v411_v3 }
 0x1eb   :  { %v370_v6 = vpop.xlane.xlu1 %369  ;;  %1020 = vmatpush.xpose.msk.msrb.mxu0 %vm334_vm1, %v1068_v5 }
 0x1ec   :  { %v394_v60 = vsub.f32 %v1264_v4, %v370_v6 }
 0x1ee   :  { %v1070_v7 = vpop.eup %1069  ;;  %v421_v8 = vmul.f32 1.442695, %v394_v60  ;;  %438 = vadd.xlane.f32.xlu2 %v437_v2 }
 0x1ef   :  { %1021 = vmatpush.xpose.msk.msrb.mxu0 %vm334_vm1, %v1054_v36  ;;  %1025 = vmatpush.xpose.msk.msrb.mxu1 %vm334_vm1, %v1070_v7  ;;  %v452_v9 = vsel %vm334_vm1, %v1070_v7, 0.0  ;;  %v1072_v10 = vpop.eup %1071 }
 0x1f0   :  { %1073 = vpow2.f32 %v421_v8  ;;  %453 = vadd.xlane.f32.xlu0 %v452_v9  ;;  %v449_v29 = vsel %vm334_vm1, %v1072_v10, 0.0  ;;  %v1409_v9 = vand.u32 127, %v899_v55 }
 0x1f3   :  { %1026 = vmatpush.xpose.msk.msrb.mxu1 %vm334_vm1, %v1072_v10  ;;  %v373_v11 = vpop.xlane.xlu1 %372  ;;  %1022 = vmatpush.xpose.msk.msrb.mxu0 %vm334_vm1, %v1273_v20 }
 0x1f4   :  { %v395_v4 = vsub.f32 %v1216_v42, %v373_v11 }
 0x1f6   :  { %v1074_v13 = vpop.eup %1073  ;;  %v423_v14 = vmul.f32 1.442695, %v395_v4  ;;  %474 = vadd.xlane.f32.xlu2 %v473_v12  ;;  %1023 = vmatmul.msk.f32.vlgmr.msrb.gmra.mxu0 %vm334_vm1, %v25_v15 }
 0x1f7   :  { %1031 = vmatpush.xpose.msk.msrb.mxu2 %vm334_vm1, %v1074_v13  ;;  %v464_v42 = vsel %vm334_vm1, %v1074_v13, 0.0 }
 0x1f8   :  { %1075 = vpow2.f32 %v423_v14 }
 0x1fb   :  { %1032 = vmatpush.xpose.msk.msrb.mxu2 %vm334_vm1, %v1064_v57  ;;  %v352_v16 = vpop.xlane.xlu1 %351 }
 0x1fc   :  { %v388_v17 = vsub.f32 %v1244_v58, %v352_v16  ;;  %v26_v58 = vld [vmem:[%s1757_s0 + $0x28] sm:$0xff]  ;;  %v1424_v16 = vadd.s32 4294967288, %v1409_v9 }
 0x1fe   :  { %v1076_v18 = vpop.eup %1075  ;;  %v409_v19 = vmul.f32 1.442695, %v388_v17  ;;  %465 = vadd.xlane.f32.xlu2 %v464_v42  ;;  %1024 = vmatmul.msk.f32.gmra.mxu0 %vm334_vm1, %v26_v58 }
 0x1ff   :  { %1033 = vmatpush.xpose.msk.msrb.mxu2 %vm334_vm1, %v1062_v56  ;;  %1040 = vmatpush.xpose.msk.msrb.mxu3 %vm334_vm1, %v1076_v18  ;;  %v467_v20 = vsel %vm334_vm1, %v1076_v18, 0.0 }
 0x200   :  { %1077 = vpow2.f32 %v409_v19  ;;  %468 = vadd.xlane.f32.xlu1 %v467_v20 }
 0x202   :  { %1041 = vmatmul.msk.f32.vlgmr.msrb.gmra.mxu3 %vm334_vm1, %v31_v21 }
 0x203   :  { %1034 = vmatpush.xpose.msk.msrb.mxu2 %vm334_vm1, %v1282_v27  ;;  %v30_v27 = vld [vmem:[%s1757_s0 + $0x88] sm:$0xff]  ;;  %s1137_s0 = smov [#allocation2]  }
 0x204   :  { %s989_s25 = sshll.u32 %s1137_s0, 4  ;;  %s990_s25 = int_to_ptr.vmem [resolvable:$true] %s989_s25 }
 0x206   :  { %v1078_v24 = vpop.eup %1077  ;;  %1035 = vmatmul.msk.f32.vlgmr.msrb.gmra.mxu2 %vm334_vm1, %v29_v23 }
 0x207   :  { %1027 = vmatpush.xpose.msk.msrb.mxu1 %vm334_vm1, %v1078_v24  ;;  %v446_v25 = vsel %vm334_vm1, %v1078_v24, 0.0 }
 0x208   :  { %447 = vadd.xlane.f32.xlu1 %v446_v25 }
 0x20a   :  { %1042 = vmatmul.msk.f32.gmra.mxu3 %vm334_vm1, %v32_v26 }
 0x20b   :  { %1028 = vmatpush.xpose.msk.msrb.mxu1 %vm334_vm1, %v1292_v44 }
 0x20e   :  { %1036 = vmatmul.msk.f32.gmra.mxu2 %vm334_vm1, %v30_v27  ;;  %1029 = vmatmul.msk.f32.vlgmr.msrb.gmra.mxu1 %vm334_vm1, %v27_v28  ;;  %v1445_v27 = vadd.s32 4294967280, %v1409_v9 }
 0x210   :  { %450 = vadd.xlane.f32.xlu1 %v449_v29 }
 0x216   :  { %1030 = vmatmul.msk.f32.gmra.mxu1 %vm334_vm1, %v28_v30 }
 0x218   :  { %441 = vadd.xlane.f32.xlu1 %v440_v31 }
 0x220   :  { %477 = vadd.xlane.f32.xlu1 %v476_v32 }
 0x239   :  { %v433_v35 = vpop.xlane.xlu1 %432 }
 0x23a   :  { %1079 = vrcp.f32 %v433_v35  ;;  %v654_v56 = vand.u32 2147483648, %v433_v35  ;;  %vm648_vm4 = vweird.f32 %v433_v35  ;;  %v652_v48 = vand.u32 2147483647, %v433_v35 }
 0x23c   :  { %v655_v5 = vor.u32 1.1754944e-38, %v654_v56  ;;  %vm653_vm8 = vcmp.eq.f32.partialorder %v652_v48, 8.507059e+37 }
 0x240   :  { %v1080_v39 = vpop.eup %1079 }
 0x241   :  { %v457_v33 = vpop.xlane.xlu0 %456  ;;  %v644_v41 = vmul.f32 %v1080_v39, %v433_v35  ;;  %vm649_vm2 = vweird.f32 %v1080_v39 }
 0x242   :  { %1081 = vrcp.f32 %v457_v33  ;;  %v774_v61 = vand.u32 2147483648, %v457_v33  ;;  %vm1399_vm5 = vmor %vm648_vm4, %vm649_vm2  ;;  %vm768_vm6 = vweird.f32 %v457_v33  ;;  %v772_v0 = vand.u32 2147483647, %v457_v33 }
 0x243   :  { %v645_v22 = vsub.f32 1.0, %v644_v41 }
 0x244   :  { %v775_v7 = vor.u32 1.1754944e-38, %v774_v61  ;;  %vm773_vm9 = vcmp.eq.f32.partialorder %v772_v0, 8.507059e+37 }
 0x245   :  { %v646_v49 = vmul.f32 %v1080_v39, %v645_v22 }
 0x247   :  { %v647_v53 = vadd.f32 %v1080_v39, %v646_v49 }
 0x248   :  { %v1082_v40 = vpop.eup %1081 }
 0x249   :  { %v1370_v34 = vpop.xlane.xlu0 %435  ;;  %v764_v43 = vmul.f32 %v1082_v40, %v457_v33  ;;  %vm769_vm3 = vweird.f32 %v1082_v40  ;;  %v651_v3 = vsel %vm1399_vm5, %v1080_v39, %v647_v53 }
 0x24a   :  { %1083 = vrcp.f32 %v1370_v34  ;;  %vm770_vm7 = vmor %vm768_vm6, %vm769_vm3  ;;  %v1413_v11 = vsel %vm653_vm8, %v655_v5, %v651_v3  ;;  %v669_v12 = vand.u32 2147483648, %v1370_v34  ;;  %vm663_vm10 = vweird.f32 %v1370_v34 }
 0x24b   :  { %v765_v46 = vsub.f32 1.0, %v764_v43  ;;  %v667_v19 = vand.u32 2147483647, %v1370_v34  ;;  %v901_v23 = vperm.slane %v1413_v11, %v1409_v9 }
 0x24c   :  { %v670_v25 = vor.u32 1.1754944e-38, %v669_v12 }
 0x24d   :  { %v766_v50 = vmul.f32 %v1082_v40, %v765_v46  ;;  %vm1463_vm13 = vcmp.eq.f32.partialorder %v667_v19, 8.507059e+37 }
 0x24f   :  { %v767_v57 = vadd.f32 %v1082_v40, %v766_v50 }
 0x250   :  { %v1384_v44 = vpop.eup %1083 }
 0x251   :  { %v1372_v36 = vpop.xlane.xlu2 %444  ;;  %v1374_v37 = vpop.xlane.xlu0 %471  ;;  %v659_v52 = vmul.f32 %v1384_v44, %v1370_v34  ;;  %v771_v6 = vsel %vm770_vm7, %v1082_v40, %v767_v57  ;;  %vm664_vm11 = vweird.f32 %v1384_v44 }
 0x252   :  { %v1417_v13 = vsel %vm773_vm9, %v775_v7, %v771_v6  ;;  %v849_v14 = vand.u32 2147483648, %v1374_v37  ;;  %v714_v42 = vand.u32 2147483648, %v1372_v36  ;;  %v847_v28 = vand.u32 2147483647, %v1374_v37  ;;  %vm1459_vm12 = vmor %vm663_vm10, %vm664_vm11 }
 0x253   :  { %v660_v1 = vsub.f32 1.0, %v659_v52  ;;  %v712_v29 = vand.u32 2147483647, %v1372_v36  ;;  %v921_v30 = vperm.slane %v1417_v13, %v1409_v9  ;;  %vm708_vm0 = vweird.f32 %v1372_v36 }
 0x254   :  { %v1452_v31 = vor.u32 1.1754944e-38, %v849_v14  ;;  %v1454_v33 = vor.u32 1.1754944e-38, %v714_v42  ;;  %vm843_vm2 = vweird.f32 %v1374_v37  ;;  %vm904_vm9 = vcmask 130112  }
 0x255   :  { %v661_v4 = vmul.f32 %v1384_v44, %v660_v1  ;;  %vm1502_vm8 = vcmp.eq.f32.partialorder %v712_v29, 8.507059e+37 }
 0x257   :  { %v1439_v24 = vadd.f32 %v1384_v44, %v661_v4 }
 0x259   :  { %v1376_v38 = vpop.xlane.xlu2 %459  ;;  %v1381_v47 = vpop.xlane.xlu0 %462  ;;  %v666_v34 = vsel %vm1459_vm12, %v1384_v44, %v1439_v24 }
 0x25a   :  { %1085 = vrcp.f32 %v1376_v38  ;;  %v804_v46 = vand.u32 2147483648, %v1381_v47  ;;  %v789_v49 = vand.u32 2147483648, %v1376_v38  ;;  %vm783_vm4 = vweird.f32 %v1376_v38 }
 0x25b   :  { %1087 = vrcp.f32 %v1381_v47  ;;  %v787_v50 = vand.u32 2147483647, %v1376_v38  ;;  %vm798_vm5 = vweird.f32 %v1381_v47  ;;  %v802_v57 = vand.u32 2147483647, %v1381_v47 }
 0x25c   :  { %1089 = vrcp.f32 %v1372_v36  ;;  %v805_v0 = vor.u32 1.1754944e-38, %v804_v46  ;;  %v790_v1 = vor.u32 1.1754944e-38, %v789_v49 }
 0x25d   :  { %1091 = vrcp.f32 %v1374_v37  ;;  %vm788_vm11 = vcmp.eq.f32.partialorder %v787_v50, 8.507059e+37 }
 0x260   :  { %v1387_v51 = vpop.eup %1085 }
 0x261   :  { %v1379_v45 = vpop.xlane.xlu2 %438  ;;  %v1395_v59 = vpop.eup %1087  ;;  %v779_v62 = vmul.f32 %v1387_v51, %v1376_v38  ;;  %vm784_vm14 = vweird.f32 %v1387_v51 }
 0x262   :  { %v794_v60 = vmul.f32 %v1395_v59, %v1381_v47  ;;  %v1407_v2 = vpop.eup %1089  ;;  %vm799_vm6 = vweird.f32 %v1395_v59  ;;  %vm1489_vm7 = vmor %vm783_vm4, %vm784_vm14  ;;  %vm908_vm14 = vcmask 195712  }
 0x263   :  { %v780_v8 = vsub.f32 1.0, %v779_v62  ;;  %v1411_v10 = vpop.eup %1091  ;;  %v704_v17 = vmul.f32 %v1407_v2, %v1372_v36  ;;  %v1442_v26 = vpop.xlane.xlu0 %453  ;;  %vm709_vm3 = vweird.f32 %v1407_v2  ;;  %vm1514_vm10 = vmor %vm798_vm5, %vm799_vm6  ;;  %vm803_vm5 = vcmp.eq.f32.partialorder %v802_v57, 8.507059e+37 }
 0x264   :  { %v795_v18 = vsub.f32 1.0, %v794_v60  ;;  %v839_v20 = vmul.f32 %v1411_v10, %v1374_v37  ;;  %vm844_vm15 = vweird.f32 %v1411_v10  ;;  %v759_v55 = vand.u32 2147483648, %v1442_v26 }
 0x265   :  { %v781_v21 = vmul.f32 %v1387_v51, %v780_v8  ;;  %v705_v32 = vsub.f32 1.0, %v704_v17  ;;  %v1532_v17 = vsel %vm1463_vm13, %v670_v25, %v666_v34  ;;  %vm1551_vm13 = vmor %vm843_vm2, %vm844_vm15  ;;  %vm678_vm15 = vweird.f32 %v1379_v45 }
 0x266   :  { %v796_v35 = vmul.f32 %v1395_v59, %v795_v18  ;;  %v840_v41 = vsub.f32 1.0, %v839_v20  ;;  %vm753_vm2 = vweird.f32 %v1442_v26 }
 0x267   :  { %v782_v43 = vadd.f32 %v1387_v51, %v781_v21  ;;  %v706_v44 = vmul.f32 %v1407_v2, %v705_v32  ;;  %v1559_v32 = vadd.s32 4294967272, %v1409_v9 }
 0x268   :  { %v797_v53 = vadd.f32 %v1395_v59, %v796_v35  ;;  %v841_v38 = vmul.f32 %v1411_v10, %v840_v41 }
 0x269   :  { %v1392_v54 = vpop.xlane.xlu2 %474  ;;  %v786_v48 = vsel %vm1489_vm7, %v1387_v51, %v782_v43  ;;  %v707_v7 = vadd.f32 %v1407_v2, %v706_v44  ;;  %vm1540_vm7 = vmor %vm708_vm0, %vm709_vm3  ;;  %v682_v44 = vand.u32 2147483647, %v1379_v45  ;;  %vm912_vm0 = vcmask 261312  }
 0x26a   :  { %v791_v8 = vsel %vm788_vm11, %v790_v1, %v786_v48  ;;  %v801_v47 = vsel %vm1514_vm10, %v1395_v59, %v797_v53  ;;  %v1526_v12 = vadd.f32 %v1411_v10, %v841_v38  ;;  %v684_v53 = vand.u32 2147483648, %v1379_v45 }
 0x26b   :  { %v806_v19 = vsel %vm803_vm5, %v805_v0, %v801_v47  ;;  %v922_v20 = vperm.slane %v791_v8, %v1424_v16  ;;  %v711_v36 = vsel %vm1540_vm7, %v1407_v2, %v707_v7  ;;  %v903_v2 = vperm.slane %v1532_v17, %v1424_v16 }
 0x26c   :  { %v846_v35 = vsel %vm1551_vm13, %v1411_v10, %v1526_v12  ;;  %v924_v43 = vperm.slane %v806_v19, %v1445_v27  ;;  %v1580_v34 = vsel %vm1502_vm8, %v1454_v33, %v711_v36  ;;  %v757_v33 = vand.u32 2147483647, %v1442_v26 }
 0x26d   :  { %v923_v49 = vsel %vm904_vm9, %v922_v20, %v921_v30  ;;  %v685_v8 = vor.u32 1.1754944e-38, %v684_v53 }
 0x26e   :  { %v925_v57 = vsel %vm908_vm14, %v924_v43, %v923_v49  ;;  %vm1640_vm7 = vcmp.eq.f32.partialorder %v757_v33, 8.507059e+37  ;;  %v760_v49 = vor.u32 1.1754944e-38, %v759_v55 }
 0x271   :  { %v1421_v15 = vpop.xlane.xlu2 %465 }
 0x272   :  { %1093 = vrcp.f32 %v1421_v15  ;;  %v819_v3 = vand.u32 2147483648, %v1421_v15  ;;  %v817_v60 = vand.u32 2147483647, %v1421_v15  ;;  %vm813_vm4 = vweird.f32 %v1421_v15 }
 0x273   :  { %v1434_v58 = vpop.xlane.xlu1 %468  ;;  %1095 = vrcp.f32 %v1379_v45 }
 0x274   :  { %1097 = vrcp.f32 %v1442_v26  ;;  %v820_v18 = vor.u32 1.1754944e-38, %v819_v3  ;;  %vm818_vm10 = vcmp.eq.f32.partialorder %v817_v60, 8.507059e+37 }
 0x278   :  { %v1094_v22 = vpop.eup %1093 }
 0x279   :  { %v809_v52 = vmul.f32 %v1094_v22, %v1421_v15  ;;  %v1493_v56 = vpop.eup %1095  ;;  %vm814_vm12 = vweird.f32 %v1094_v22 }
 0x27a   :  { %v1508_v5 = vpop.eup %1097  ;;  %v674_v4 = vmul.f32 %v1493_v56, %v1379_v45  ;;  %vm815_vm6 = vmor %vm813_vm4, %vm814_vm12  ;;  %vm679_vm8 = vweird.f32 %v1493_v56  ;;  %vm1608_vm12 = vcmp.eq.f32.partialorder %v682_v44, 8.507059e+37 }
 0x27b   :  { %v810_v61 = vsub.f32 1.0, %v809_v52  ;;  %v1500_v62 = vpop.xlane.xlu1 %447  ;;  %v749_v42 = vmul.f32 %v1508_v5, %v1442_v26  ;;  %vm754_vm4 = vweird.f32 %v1508_v5 }
 0x27c   :  { %1099 = vrcp.f32 %v1500_v62  ;;  %v675_v25 = vsub.f32 1.0, %v674_v4  ;;  %v729_v63 = vand.u32 2147483648, %v1500_v62  ;;  %vm723_vm11 = vweird.f32 %v1500_v62 }
 0x27d   :  { %v811_v6 = vmul.f32 %v1094_v22, %v810_v61  ;;  %1101 = vrcp.f32 %v1434_v58  ;;  %v750_v41 = vsub.f32 1.0, %v749_v42 }
 0x27e   :  { %1103 = vrcp.f32 %v1392_v54  ;;  %v676_v52 = vmul.f32 %v1493_v56, %v675_v25  ;;  %v730_v20 = vor.u32 1.1754944e-38, %v729_v63  ;;  %v514_v63 = vpop.f32.mrf.mxu0 }
 0x27f   :  { %v812_v14 = vadd.f32 %v1094_v22, %v811_v6  ;;  %v751_v13 = vmul.f32 %v1508_v5, %v750_v41  ;;  %v727_v6 = vand.u32 2147483647, %v1500_v62 }
 0x280   :  { %v677_v51 = vadd.f32 %v1493_v56, %v676_v52 }
 0x281   :  { %v816_v15 = vsel %vm815_vm6, %v1094_v22, %v812_v14  ;;  %vm1632_vm6 = vmor %vm678_vm15, %vm679_vm8 }
 0x282   :  { %v1545_v21 = vpop.eup %1099  ;;  %v821_v29 = vsel %vm818_vm10, %v820_v18, %v816_v15  ;;  %vm728_vm10 = vcmp.eq.f32.partialorder %v727_v6, 8.507059e+37  ;;  %v681_v45 = vsel %vm1632_vm6, %v1493_v56, %v677_v51  ;;  %vm1652_vm15 = vmor %vm753_vm2, %vm754_vm4  ;;  %v864_v56 = vand.u32 2147483648, %v1392_v54 }
 0x283   :  { %v719_v39 = vmul.f32 %v1545_v21, %v1500_v62  ;;  %v1568_v40 = vpop.xlane.xlu1 %450  ;;  %v1575_v22 = vpop.eup %1101  ;;  %v926_v50 = vperm.slane %v821_v29, %v1559_v32  ;;  %vm724_vm3 = vweird.f32 %v1545_v21  ;;  %v752_v62 = vadd.f32 %v1508_v5, %v751_v13 }
 0x284   :  { %1105 = vrcp.f32 %v1568_v40  ;;  %v824_v30 = vmul.f32 %v1575_v22, %v1434_v58  ;;  %v1599_v48 = vpop.eup %1103  ;;  %vm1615_vm5 = vmor %vm723_vm11, %vm724_vm3  ;;  %v744_v29 = vand.u32 2147483648, %v1568_v40  ;;  %vm738_vm2 = vweird.f32 %v1568_v40 }
 0x285   :  { %v720_v46 = vsub.f32 1.0, %v719_v39  ;;  %v927_v1 = vsel %vm912_vm0, %v926_v50, %v925_v57  ;;  %v854_v19 = vmul.f32 %v1599_v48, %v1392_v54  ;;  %v1665_v53 = vsel %vm1608_vm12, %v685_v8, %v681_v45 }
 0x286   :  { %v825_v42 = vsub.f32 1.0, %v824_v30  ;;  %v745_v13 = vor.u32 1.1754944e-38, %v744_v29  ;;  %vm1676_vm12 = vcmp.eq.f32.partialorder %v847_v28, 8.507059e+37  ;;  %vm829_vm4 = vweird.f32 %v1575_v22  ;;  %v517_v24 = vpop.f32.mrf.mxu0 }
 0x287   :  { %v721_v38 = vmul.f32 %v1545_v21, %v720_v46  ;;  %v756_v46 = vsel %vm1652_vm15, %v1508_v5, %v752_v62  ;;  %v855_v52 = vsub.f32 1.0, %v854_v19  ;;  %v832_v28 = vand.u32 2147483647, %v1434_v58 }
 0x288   :  { %v826_v50 = vmul.f32 %v1575_v22, %v825_v42  ;;  %v907_v39 = vperm.slane %v1665_v53, %v1445_v27 }
 0x289   :  { %v722_v61 = vadd.f32 %v1545_v21, %v721_v38  ;;  %v596_v0 = vpop.f32.mrf.mxu2  ;;  %v834_v38 = vand.u32 2147483648, %v1434_v58 }
 0x28a   :  { %v1106_v3 = vpop.eup %1105  ;;  %v973_v60 = vmul.f32 %v927_v1, %v596_v0  ;;  %v827_v51 = vadd.f32 %v1575_v22, %v826_v50 }
 0x28b   :  { %v734_v47 = vmul.f32 %v1106_v3, %v1568_v40  ;;  %v1620_v14 = vpop.xlane.xlu1 %441  ;;  %v726_v18 = vsel %vm1615_vm5, %v1545_v21, %v722_v61  ;;  %v555_v59 = vpop.f32.mrf.mxu1  ;;  %v914_v21 = vperm.slane %v1580_v34, %v1409_v9  ;;  %vm739_vm3 = vweird.f32 %v1106_v3 }
 0x28c   :  { %981 = vst.msk [vmem:[#allocation2 + $0x20] sm:$0xff] %vm334_vm1, %v973_v60  ;;  %1107 = vrcp.f32 %v1620_v14  ;;  %v731_v41 = vsel %vm728_vm10, %v730_v20, %v726_v18  ;;  %v742_v34 = vand.u32 2147483647, %v1568_v40  ;;  %vm740_vm8 = vmor %vm738_vm2, %vm739_vm3  ;;  %v761_v40 = vsel %vm1640_vm7, %v760_v49, %v756_v46 }
 0x28d   :  { %v735_v36 = vsub.f32 1.0, %v734_v47  ;;  %v915_v5 = vperm.slane %v731_v41, %v1424_v16  ;;  %vm828_vm5 = vweird.f32 %v1434_v58  ;;  %v699_v60 = vand.u32 2147483648, %v1620_v14 }
 0x28e   :  { %vm743_vm11 = vcmp.eq.f32.partialorder %v742_v34, 8.507059e+37  ;;  %v919_v8 = vperm.slane %v761_v40, %v1559_v32  ;;  %vm1691_vm6 = vmor %vm828_vm5, %vm829_vm4  ;;  %v697_v42 = vand.u32 2147483647, %v1620_v14  ;;  %vm859_vm10 = vweird.f32 %v1599_v48  ;;  %v637_v34 = vpop.f32.mrf.mxu3 }
 0x28f   :  { %v736_v43 = vmul.f32 %v1106_v3, %v735_v36  ;;  %v916_v7 = vsel %vm904_vm9, %v915_v5, %v914_v21  ;;  %v831_v58 = vsel %vm1691_vm6, %v1575_v22, %v827_v51  ;;  %v835_v15 = vor.u32 1.1754944e-38, %v834_v38 }
 0x290   :  { %vm693_vm15 = vweird.f32 %v1620_v14  ;;  %vm833_vm3 = vcmp.eq.f32.partialorder %v832_v28, 8.507059e+37  ;;  %v700_v45 = vor.u32 1.1754944e-38, %v699_v60  ;;  %v905_v46 = vsel %vm904_vm9, %v903_v2, %v901_v23 }
 0x291   :  { %v737_v26 = vadd.f32 %v1106_v3, %v736_v43  ;;  %v599_v44 = vpop.f32.mrf.mxu2  ;;  %v836_v41 = vsel %vm833_vm3, %v835_v15, %v831_v58  ;;  %v851_v49 = vsel %vm1676_vm12, %v1452_v31, %v846_v35  ;;  %v865_v23 = vor.u32 1.1754944e-38, %v864_v56 }
 0x292   :  { %v1108_v33 = vpop.eup %1107  ;;  %v974_v55 = vmul.f32 %v927_v1, %v599_v44  ;;  %v909_v10 = vsel %vm908_vm14, %v907_v39, %v905_v46  ;;  %v928_v12 = vperm.slane %v836_v41, %v1409_v9 }
 0x293   :  { %v689_v30 = vmul.f32 %v1108_v33, %v1620_v14  ;;  %v741_v57 = vsel %vm740_vm8, %v1106_v3, %v737_v26  ;;  %v1672_v61 = vpop.xlane.xlu1 %477  ;;  %v856_v3 = vmul.f32 %v1599_v48, %v855_v52  ;;  %v558_v4 = vpop.f32.mrf.mxu1  ;;  %vm694_vm7 = vweird.f32 %v1108_v33 }
 0x294   :  { %v746_v1 = vsel %vm743_vm11, %v745_v13, %v741_v57  ;;  %982 = vst.msk [vmem:[#allocation2 + $0x28] sm:$0xff] %vm334_vm1, %v974_v55  ;;  %1109 = vrcp.f32 %v1672_v61  ;;  %vm695_vm2 = vmor %vm693_vm15, %vm694_vm7  ;;  %vm698_vm8 = vcmp.eq.f32.partialorder %v697_v42, 8.507059e+37  ;;  %vm858_vm11 = vweird.f32 %v1392_v54 }
 0x295   :  { %v690_v6 = vsub.f32 1.0, %v689_v30  ;;  %v917_v37 = vperm.slane %v746_v1, %v1445_v27  ;;  %v857_v29 = vadd.f32 %v1599_v48, %v856_v3  ;;  %v862_v14 = vand.u32 2147483647, %v1392_v54  ;;  %vm1728_vm4 = vmor %vm858_vm11, %vm859_vm10 }
 0x296   :  { %v879_v50 = vand.u32 2147483648, %v1672_v61  ;;  %v877_v52 = vand.u32 2147483647, %v1672_v61  ;;  %vm873_vm5 = vweird.f32 %v1672_v61  ;;  %v640_v30 = vpop.f32.mrf.mxu3 }
 0x297   :  { %v691_v62 = vmul.f32 %v1108_v33, %v690_v6  ;;  %v918_v18 = vsel %vm908_vm14, %v917_v37, %v916_v7  ;;  %v861_v31 = vsel %vm1728_vm4, %v1599_v48, %v857_v29  ;;  %vm863_vm12 = vcmp.eq.f32.partialorder %v862_v14, 8.507059e+37 }
 0x298   :  { %v920_v19 = vsel %vm912_vm0, %v919_v8, %v918_v18  ;;  %v866_v53 = vsel %vm863_vm12, %v865_v23, %v861_v31  ;;  %v880_v38 = vor.u32 1.1754944e-38, %v879_v50  ;;  %vm878_vm7 = vcmp.eq.f32.partialorder %v877_v52, 8.507059e+37 }
 0x299   :  { %v692_v20 = vadd.f32 %v1108_v33, %v691_v62  ;;  %v971_v36 = vmul.f32 %v920_v19, %v555_v59  ;;  %v972_v21 = vmul.f32 %v920_v19, %v558_v4  ;;  %v931_v5 = vperm.slane %v866_v53, %v1445_v27 }
 0x29a   :  { %v1110_v25 = vpop.eup %1109 }
 0x29b   :  { %979 = vst.msk [vmem:[#allocation2 + $0x10] sm:$0xff] %vm334_vm1, %v971_v36  ;;  %v869_v22 = vmul.f32 %v1110_v25, %v1672_v61  ;;  %v696_v43 = vsel %vm695_vm2, %v1108_v33, %v692_v20  ;;  %vm874_vm13 = vweird.f32 %v1110_v25  ;;  %v929_v33 = vperm.slane %v851_v49, %v1424_v16 }
 0x29c   :  { %v701_v59 = vsel %vm698_vm8, %v700_v45, %v696_v43  ;;  %980 = vst.msk [vmem:[#allocation2 + $0x18] sm:$0xff] %vm334_vm1, %v972_v21  ;;  %vm875_vm6 = vmor %vm873_vm5, %vm874_vm13 }
 0x29d   :  { %v870_v17 = vsub.f32 1.0, %v869_v22  ;;  %v911_v2 = vperm.slane %v701_v59, %v1559_v32  ;;  %v930_v48 = vsel %vm904_vm9, %v929_v33, %v928_v12 }
 0x29e   :  { %v932_v16 = vsel %vm908_vm14, %v931_v5, %v930_v48 }
 0x29f   :  { %v871_v35 = vmul.f32 %v1110_v25, %v870_v17  ;;  %v913_v54 = vsel %vm912_vm0, %v911_v2, %v909_v10 }
 0x2a0   :  { %v969_v56 = vmul.f32 %v913_v54, %v514_v63  ;;  %v970_v26 = vmul.f32 %v913_v54, %v517_v24 }
 0x2a1   :  { %v872_v44 = vadd.f32 %v1110_v25, %v871_v35 }
 0x2a2   :  { %977 = vst.msk [vmem:[#allocation2] sm:$0xff] %vm334_vm1, %v969_v56 }
 0x2a3   :  { %v876_v9 = vsel %vm875_vm6, %v1110_v25, %v872_v44  ;;  %978 = vst.msk [vmem:[#allocation2 + $0x8] sm:$0xff] %vm334_vm1, %v970_v26 }
 0x2a4   :  { %v881_v13 = vsel %vm878_vm7, %v880_v38, %v876_v9 }
 0x2a5   :  { %v933_v55 = vperm.slane %v881_v13, %v1559_v32 }
 0x2a7   :  { %v934_v57 = vsel %vm912_vm0, %v933_v55, %v932_v16 }
 0x2a8   :  { %v975_v40 = vmul.f32 %v934_v57, %v637_v34  ;;  %v976_v61 = vmul.f32 %v934_v57, %v640_v30 }
 0x2aa   :  { %983 = vst.msk [vmem:[#allocation2 + $0x30] sm:$0xff] %vm334_vm1, %v975_v40 }
 0x2ab   :  { %984 = vst.msk [vmem:[#allocation2 + $0x38] sm:$0xff] %vm334_vm1, %v976_v61 }
 0x2ac   :  { %997 = dma.vmem_to_hbm [thread:$0]  %s990_s25, 1024, %s992_s28, [#allocation3], %s1138_s29, %s1138_s29, %s1139_s30  }
 0x2ad   :  { %1135 = dma.done.wait [#allocation3], 1024  }
 0x2ae   :  { %1136 = vsyncadd [#allocation3], 4294966272 }
 0x2af   :  { %1002 = vsyncpa [#allocation3], 1 }

</bundles_post_ra>
